<compile_context>
chip_gen: v6e
topology: v6e:2x2x1
jax: 0.10.0
libtpu: 0.0.40
codegen_flags: <defaults>
</compile_context>

<pallas_src>
import jax
import jax.numpy as jnp
from jax.experimental import pallas as pl
from jax.experimental.pallas import tpu as pltpu


def _round_up(x, m):
    return (x + m - 1) // m * m


def mlnet_kernel(x_ref,
                 w1_ref, b1_ref,
                 w2_ref, b2_ref,
                 w3_ref, b3_ref,
                 w4_ref, b4_ref,
                 o_ref):
    # fc1 + relu: f32 input tile cast to bf16 on-chip, f32 MXU accumulation.
    h = jnp.dot(x_ref[...].astype(jnp.bfloat16), w1_ref[...],
                preferred_element_type=jnp.float32)
    h = jnp.maximum(h + b1_ref[...], 0.0)
    # fc2 + relu
    h = jnp.dot(h.astype(jnp.bfloat16), w2_ref[...],
                preferred_element_type=jnp.float32)
    h = jnp.maximum(h + b2_ref[...], 0.0)
    # fc3 + relu
    h = jnp.dot(h.astype(jnp.bfloat16), w3_ref[...],
                preferred_element_type=jnp.float32)
    h = jnp.maximum(h + b3_ref[...], 0.0)
    # fc4: 128-lane padded weights on the MXU, narrow (TB, num_classes) store.
    h = jnp.dot(h.astype(jnp.bfloat16), w4_ref[...],
                preferred_element_type=jnp.float32)
    h = h + b4_ref[...]
    o_ref[...] = h[:, :o_ref.shape[-1]].astype(o_ref.dtype)


def prepare_params(params, num_classes):
    """One-time parameter prep (hoisted out of the per-call forward):
    bf16 weights for the MXU, fc4 weight/bias lane-padded to 128 columns."""
    NP = _round_up(max(num_classes, 128), 128)
    w4 = jnp.zeros((params["w4"].shape[0], NP), jnp.bfloat16).at[
        :, :num_classes].set(params["w4"].astype(jnp.bfloat16))
    b4 = jnp.zeros((1, NP), jnp.float32).at[:, :num_classes].set(params["b4"])
    return {
        "w1": params["w1"].astype(jnp.bfloat16), "b1": params["b1"],
        "w2": params["w2"].astype(jnp.bfloat16), "b2": params["b2"],
        "w3": params["w3"].astype(jnp.bfloat16), "b3": params["b3"],
        "w4": w4, "b4": b4,
        "num_classes": num_classes,
    }


def _choose_tb(B, block_b):
    """Batch tile: big enough that per-step overhead is hidden, multiple of 8
    (f32 sublanes), and — when there is more than one grid step — an even
    number of steps so v7x's 2 TensorCores get balanced work."""
    if B <= block_b:
        return _round_up(B, 8)
    steps = pl.cdiv(B, block_b)
    if steps % 2:
        steps += 1
    tb = _round_up(pl.cdiv(B, steps), 128)      # MXU/lane friendly
    if pl.cdiv(B, tb) % 2:                      # rounding changed parity
        tb = _round_up(pl.cdiv(B, steps), 8)
    return tb


def mlnet_forward(x, prepped, *, block_b=512):
    """x: (B, input_dim) f32.  prepped: output of prepare_params.
    Returns (B, num_classes) f32 logits."""
    B, input_dim = x.shape
    num_classes = prepped["num_classes"]
    w1, b1 = prepped["w1"], prepped["b1"]
    w2, b2 = prepped["w2"], prepped["b2"]
    w3, b3 = prepped["w3"], prepped["b3"]
    w4, b4 = prepped["w4"], prepped["b4"]
    NP = w4.shape[1]

    TB = _choose_tb(B, block_b)
    grid = (pl.cdiv(B, TB),)

    def resident(shape):
        # Same block for every grid step -> DMA'd once, stays VMEM-resident.
        return pl.BlockSpec(shape, lambda i: (0, 0))

    in_specs = [
        pl.BlockSpec((TB, input_dim), lambda i: (i, 0)),   # x batch tile (f32)
        resident(w1.shape), resident(b1.shape),
        resident(w2.shape), resident(b2.shape),
        resident(w3.shape), resident(b3.shape),
        resident(w4.shape), resident(b4.shape),
    ]
    # Narrow output block: last dim equals the full array dim -> legal, and no
    # post-kernel slice pass is needed.
    out_specs = pl.BlockSpec((TB, num_classes), lambda i: (i, 0))

    # Rough VMEM footprint: double-buffered x/out tiles + resident params
    # (x2 for the pipeline's buffering) + f32 intermediates headroom.
    weight_bytes = (w1.size + w2.size + w3.size + w4.size) * 2
    bias_bytes = (b1.size + b2.size + b3.size + b4.size) * 4
    est = (2 * TB * input_dim * 4
           + 2 * TB * num_classes * 4
           + 2 * weight_bytes + 2 * bias_bytes
           + 3 * TB * max(256, NP) * 4)
    vmem_limit = int(min(48 << 20, max(32 << 20, 2 * est)))

    flops = 2 * B * (input_dim * 256 + 256 * 128 + 128 * 64 + 64 * NP)
    bytes_accessed = (B * input_dim * 4 + B * num_classes * 4
                      + weight_bytes + bias_bytes)

    out = pl.pallas_call(
        mlnet_kernel,
        out_shape=jax.ShapeDtypeStruct((B, num_classes), jnp.float32),
        grid=grid,
        in_specs=in_specs,
        out_specs=out_specs,
        compiler_params=pltpu.CompilerParams(
            dimension_semantics=("parallel",),   # 2 TCs on v7x; no-op elsewhere
            vmem_limit_bytes=vmem_limit),
        cost_estimate=pl.CostEstimate(flops=flops, transcendentals=0,
                                      bytes_accessed=bytes_accessed),
    )(x, w1, b1, w2, b2, w3, b3, w4, b4)

    return out


def init_params(key, input_dim, num_classes=2):
    """Mirrors the module: weights ~ N(0, 0.1); biases keep the PyTorch Linear
    default U(-1/sqrt(fan_in), 1/sqrt(fan_in)).  Weights stored (in, out)."""
    dims = [(input_dim, 256), (256, 128), (128, 64), (64, num_classes)]
    params = {}
    for i, (fan_in, fan_out) in enumerate(dims, start=1):
        key, kw, kb = jax.random.split(key, 3)
        w = 0.1 * jax.random.normal(kw, (fan_in, fan_out), dtype=jnp.float32)
        bound = 1.0 / (fan_in ** 0.5)
        b = jax.random.uniform(kb, (1, fan_out), dtype=jnp.float32,
                               minval=-bound, maxval=bound)
        params[f"w{i}"] = w
        params[f"b{i}"] = b
    return params


def mlnet_reference_f32(x, params):
    h = jnp.maximum(x @ params["w1"] + params["b1"], 0.0)
    h = jnp.maximum(h @ params["w2"] + params["b2"], 0.0)
    h = jnp.maximum(h @ params["w3"] + params["b3"], 0.0)
    return h @ params["w4"] + params["b4"]


def mlnet_reference_bf16(x, params):
    """Same dtype treatment as the kernel (bf16 MXU inputs, f32 accumulation)."""
    def dot(a, w):
        return jnp.dot(a.astype(jnp.bfloat16), w.astype(jnp.bfloat16),
                       preferred_element_type=jnp.float32)
    h = jnp.maximum(dot(x, params["w1"]) + params["b1"], 0.0)
    h = jnp.maximum(dot(h, params["w2"]) + params["b2"], 0.0)
    h = jnp.maximum(dot(h, params["w3"]) + params["b3"], 0.0)
    return dot(h, params["w4"]) + params["b4"]


if __name__ == "__main__":
    key = jax.random.PRNGKey(0)

    # Small demo shape (single grid step, 8-sublane tile).
    batch, input_dim, num_classes = 8, 32, 2
    key, kx, kp = jax.random.split(key, 3)
    x = jax.random.normal(kx, (batch, input_dim), dtype=jnp.float32)
    params = init_params(kp, input_dim, num_classes)
    prepped = prepare_params(params, num_classes)

    out = jax.block_until_ready(mlnet_forward(x, prepped))
    assert out.shape == (batch, num_classes)
    assert jnp.allclose(out, mlnet_reference_bf16(x, params),
                        atol=1e-3, rtol=1e-3)
    assert jnp.allclose(out, mlnet_reference_f32(x, params),
                        atol=5e-2, rtol=5e-2)

    # Larger shape: exercises the batch grid (even step count), the ragged
    # last tile (masked loads/stores), and resident-weight reuse across steps.
    key, kx2, kp2 = jax.random.split(key, 3)
    B2, D2 = 600, 128
    x2 = jax.random.normal(kx2, (B2, D2), dtype=jnp.float32)
    params2 = init_params(kp2, D2, num_classes)
    prepped2 = prepare_params(params2, num_classes)
    out2 = jax.block_until_ready(mlnet_forward(x2, prepped2))
    assert out2.shape == (B2, num_classes)
    assert jnp.allclose(out2, mlnet_reference_bf16(x2, params2),
                        atol=1e-3, rtol=1e-3)

    print("KERNEL_OK")
</pallas_src>

<mosaic_0001>
module attributes {stable_mosaic.version = 11 : i64} {
  func.func @mlnet_kernel(%arg0: i32, %arg1: memref<8x32xf32, #tpu.memory_space<vmem>>, %arg2: memref<32x256xbf16, #tpu.memory_space<vmem>>, %arg3: memref<1x256xf32, #tpu.memory_space<vmem>>, %arg4: memref<256x128xbf16, #tpu.memory_space<vmem>>, %arg5: memref<1x128xf32, #tpu.memory_space<vmem>>, %arg6: memref<128x64xbf16, #tpu.memory_space<vmem>>, %arg7: memref<1x64xf32, #tpu.memory_space<vmem>>, %arg8: memref<64x128xbf16, #tpu.memory_space<vmem>>, %arg9: memref<1x128xf32, #tpu.memory_space<vmem>>, %arg10: memref<8x2xf32, #tpu.memory_space<vmem>>) attributes {dimension_semantics = [#tpu.dimension_semantics<parallel>], iteration_bounds = array<i64: 1>, scalar_prefetch = 0 : i64, scratch_operands = 0 : i64, tpu.core_type = #tpu.core_type<tc>, window_params = [{transform_indices = @transform_0, window_bounds = array<i64: 8, 32>}, {pipeline_mode = #tpu.pipeline_mode<synchronous>, transform_indices = @transform_1, window_bounds = array<i64: 32, 256>}, {pipeline_mode = #tpu.pipeline_mode<synchronous>, transform_indices = @transform_2, window_bounds = array<i64: 1, 256>}, {pipeline_mode = #tpu.pipeline_mode<synchronous>, transform_indices = @transform_3, window_bounds = array<i64: 256, 128>}, {pipeline_mode = #tpu.pipeline_mode<synchronous>, transform_indices = @transform_4, window_bounds = array<i64: 1, 128>}, {pipeline_mode = #tpu.pipeline_mode<synchronous>, transform_indices = @transform_5, window_bounds = array<i64: 128, 64>}, {pipeline_mode = #tpu.pipeline_mode<synchronous>, transform_indices = @transform_6, window_bounds = array<i64: 1, 64>}, {pipeline_mode = #tpu.pipeline_mode<synchronous>, transform_indices = @transform_7, window_bounds = array<i64: 64, 128>}, {pipeline_mode = #tpu.pipeline_mode<synchronous>, transform_indices = @transform_8, window_bounds = array<i64: 1, 128>}, {transform_indices = @transform_9, window_bounds = array<i64: 8, 2>}]} {
    %c0 = arith.constant 0 : index
    %c0_0 = arith.constant 0 : index
    %0 = vector.load %arg1[%c0, %c0_0] : memref<8x32xf32, #tpu.memory_space<vmem>>, vector<8x32xf32>
    %1 = arith.truncf %0 : vector<8x32xf32> to vector<8x32xbf16>
    %c0_1 = arith.constant 0 : index
    %c0_2 = arith.constant 0 : index
    %2 = vector.load %arg2[%c0_1, %c0_2] : memref<32x256xbf16, #tpu.memory_space<vmem>>, vector<32x256xbf16>
    %cst = arith.constant dense<0.000000e+00> : vector<8x256xf32>
    %3 = tpu.matmul %1, %2, %cst {dimension_numbers = #tpu.dot_dimension_numbers<[1], [0], [0], [1], [0, 0, 1, 1], [], []>} : vector<8x32xbf16>, vector<32x256xbf16>, vector<8x256xf32> -> vector<8x256xf32>
    %c0_3 = arith.constant 0 : index
    %c0_4 = arith.constant 0 : index
    %4 = vector.load %arg3[%c0_3, %c0_4] : memref<1x256xf32, #tpu.memory_space<vmem>>, vector<1x256xf32>
    %5 = vector.broadcast %4 : vector<1x256xf32> to vector<8x256xf32>
    %6 = arith.addf %3, %5 : vector<8x256xf32>
    %cst_5 = arith.constant 0.000000e+00 : f32
    %7 = vector.broadcast %cst_5 : f32 to vector<8x256xf32>
    %8 = arith.maximumf %6, %7 : vector<8x256xf32>
    %9 = arith.truncf %8 : vector<8x256xf32> to vector<8x256xbf16>
    %c0_6 = arith.constant 0 : index
    %c0_7 = arith.constant 0 : index
    %10 = vector.load %arg4[%c0_6, %c0_7] : memref<256x128xbf16, #tpu.memory_space<vmem>>, vector<256x128xbf16>
    %cst_8 = arith.constant dense<0.000000e+00> : vector<8x128xf32>
    %11 = tpu.matmul %9, %10, %cst_8 {dimension_numbers = #tpu.dot_dimension_numbers<[1], [0], [0], [1], [0, 0, 1, 1], [], []>} : vector<8x256xbf16>, vector<256x128xbf16>, vector<8x128xf32> -> vector<8x128xf32>
    %c0_9 = arith.constant 0 : index
    %c0_10 = arith.constant 0 : index
    %12 = vector.load %arg5[%c0_9, %c0_10] : memref<1x128xf32, #tpu.memory_space<vmem>>, vector<1x128xf32>
    %13 = vector.broadcast %12 : vector<1x128xf32> to vector<8x128xf32>
    %14 = arith.addf %11, %13 : vector<8x128xf32>
    %cst_11 = arith.constant 0.000000e+00 : f32
    %15 = vector.broadcast %cst_11 : f32 to vector<8x128xf32>
    %16 = arith.maximumf %14, %15 : vector<8x128xf32>
    %17 = arith.truncf %16 : vector<8x128xf32> to vector<8x128xbf16>
    %c0_12 = arith.constant 0 : index
    %c0_13 = arith.constant 0 : index
    %18 = vector.load %arg6[%c0_12, %c0_13] : memref<128x64xbf16, #tpu.memory_space<vmem>>, vector<128x64xbf16>
    %cst_14 = arith.constant dense<0.000000e+00> : vector<8x64xf32>
    %19 = tpu.matmul %17, %18, %cst_14 {dimension_numbers = #tpu.dot_dimension_numbers<[1], [0], [0], [1], [0, 0, 1, 1], [], []>} : vector<8x128xbf16>, vector<128x64xbf16>, vector<8x64xf32> -> vector<8x64xf32>
    %c0_15 = arith.constant 0 : index
    %c0_16 = arith.constant 0 : index
    %20 = vector.load %arg7[%c0_15, %c0_16] : memref<1x64xf32, #tpu.memory_space<vmem>>, vector<1x64xf32>
    %21 = vector.broadcast %20 : vector<1x64xf32> to vector<8x64xf32>
    %22 = arith.addf %19, %21 : vector<8x64xf32>
    %cst_17 = arith.constant 0.000000e+00 : f32
    %23 = vector.broadcast %cst_17 : f32 to vector<8x64xf32>
    %24 = arith.maximumf %22, %23 : vector<8x64xf32>
    %25 = arith.truncf %24 : vector<8x64xf32> to vector<8x64xbf16>
    %c0_18 = arith.constant 0 : index
    %c0_19 = arith.constant 0 : index
    %26 = vector.load %arg8[%c0_18, %c0_19] : memref<64x128xbf16, #tpu.memory_space<vmem>>, vector<64x128xbf16>
    %cst_20 = arith.constant dense<0.000000e+00> : vector<8x128xf32>
    %27 = tpu.matmul %25, %26, %cst_20 {dimension_numbers = #tpu.dot_dimension_numbers<[1], [0], [0], [1], [0, 0, 1, 1], [], []>} : vector<8x64xbf16>, vector<64x128xbf16>, vector<8x128xf32> -> vector<8x128xf32>
    %c0_21 = arith.constant 0 : index
    %c0_22 = arith.constant 0 : index
    %28 = vector.load %arg9[%c0_21, %c0_22] : memref<1x128xf32, #tpu.memory_space<vmem>>, vector<1x128xf32>
    %29 = vector.broadcast %28 : vector<1x128xf32> to vector<8x128xf32>
    %30 = arith.addf %27, %29 : vector<8x128xf32>
    %31 = vector.extract_strided_slice %30 {offsets = [0, 0], sizes = [8, 2], strides = [1, 1]} : vector<8x128xf32> to vector<8x2xf32>
    %c0_23 = arith.constant 0 : index
    %c0_24 = arith.constant 0 : index
    %32 = vector.load %arg10[%c0_23, %c0_24] : memref<8x2xf32, #tpu.memory_space<vmem>>, vector<8x2xf32>
    tpu.vector_store %arg10[%c0_23, %c0_24], %31 {strides = array<i32>} : memref<8x2xf32, #tpu.memory_space<vmem>>, vector<8x2xf32>,
    return
  }
  func.func @transform_0(%arg0: i32) -> (i32, i32) {
    %c0_i32 = arith.constant 0 : i32
    %c0_i32_0 = arith.constant 0 : i32
    return %arg0, %c0_i32 : i32, i32
  }
  func.func @transform_1(%arg0: i32) -> (i32, i32) {
    %c0_i32 = arith.constant 0 : i32
    %c0_i32_0 = arith.constant 0 : i32
    %c0_i32_1 = arith.constant 0 : i32
    return %c0_i32, %c0_i32_0 : i32, i32
  }
  func.func @transform_2(%arg0: i32) -> (i32, i32) {
    %c0_i32 = arith.constant 0 : i32
    %c0_i32_0 = arith.constant 0 : i32
    %c0_i32_1 = arith.constant 0 : i32
    return %c0_i32, %c0_i32_0 : i32, i32
  }
  func.func @transform_3(%arg0: i32) -> (i32, i32) {
    %c0_i32 = arith.constant 0 : i32
    %c0_i32_0 = arith.constant 0 : i32
    %c0_i32_1 = arith.constant 0 : i32
    return %c0_i32, %c0_i32_0 : i32, i32
  }
  func.func @transform_4(%arg0: i32) -> (i32, i32) {
    %c0_i32 = arith.constant 0 : i32
    %c0_i32_0 = arith.constant 0 : i32
    %c0_i32_1 = arith.constant 0 : i32
    return %c0_i32, %c0_i32_0 : i32, i32
  }
  func.func @transform_5(%arg0: i32) -> (i32, i32) {
    %c0_i32 = arith.constant 0 : i32
    %c0_i32_0 = arith.constant 0 : i32
    %c0_i32_1 = arith.constant 0 : i32
    return %c0_i32, %c0_i32_0 : i32, i32
  }
  func.func @transform_6(%arg0: i32) -> (i32, i32) {
    %c0_i32 = arith.constant 0 : i32
    %c0_i32_0 = arith.constant 0 : i32
    %c0_i32_1 = arith.constant 0 : i32
    return %c0_i32, %c0_i32_0 : i32, i32
  }
  func.func @transform_7(%arg0: i32) -> (i32, i32) {
    %c0_i32 = arith.constant 0 : i32
    %c0_i32_0 = arith.constant 0 : i32
    %c0_i32_1 = arith.constant 0 : i32
    return %c0_i32, %c0_i32_0 : i32, i32
  }
  func.func @transform_8(%arg0: i32) -> (i32, i32) {
    %c0_i32 = arith.constant 0 : i32
    %c0_i32_0 = arith.constant 0 : i32
    %c0_i32_1 = arith.constant 0 : i32
    return %c0_i32, %c0_i32_0 : i32, i32
  }
  func.func @transform_9(%arg0: i32) -> (i32, i32) {
    %c0_i32 = arith.constant 0 : i32
    %c0_i32_0 = arith.constant 0 : i32
    return %arg0, %c0_i32 : i32, i32
  }
}

</mosaic_0001>

<bundles_post_ra>
// kernel: tpu_custom_call.1
= control target key start
LH: loop header
LB: loop body
LE: loop exit
PB: predicated region body
PF: predicated region fallthrough
CT: control target
= control target key end

     0   :  { %14 = vsyncpa [#allocation3], 0  ;;  %s681_s30 = smov [#allocation2]   ;;  %s820_s0 = inlined_call_operand.vmem [shape: f32[8,32], index: 0, kind: input, shape index: {}]   ;;  %s821_s1 = inlined_call_operand.vmem [shape: bf16[32,256], index: 1, kind: input, shape index: {}]   ;;  %s822_s2 = inlined_call_operand.vmem [shape: f32[1,256], index: 2, kind: input, shape index: {}]   ;;  %s823_s3 = inlined_call_operand.hbm [shape: bf16[256,128], index: 3, kind: input, shape index: {}]   ;;  %s824_s4 = inlined_call_operand.vmem [shape: f32[1,128], index: 4, kind: input, shape index: {}]   ;;  %s825_s5 = inlined_call_operand.vmem [shape: bf16[128,64], index: 5, kind: input, shape index: {}]   ;;  %s826_s6 = inlined_call_operand.vmem [shape: f32[1,64], index: 6, kind: input, shape index: {}]   ;;  %s827_s7 = inlined_call_operand.vmem [shape: bf16[64,128], index: 7, kind: input, shape index: {}]   ;;  %s828_s8 = inlined_call_operand.vmem [shape: f32[1,128], index: 8, kind: input, shape index: {}]   ;;  %s829_s9 = inlined_call_operand.vmem [shape: f32[8,2], index: 9, kind: output, shape index: {}]  }
   0x1   :  { %s26_s10 = sshll.u32 %s681_s30, 4  ;;  %s27_s10 = int_to_ptr.vmem [resolvable:$true] %s26_s10 }
   0x2   :  { %s667_s11 = scalar_lea.vmem %s27_s10, 2048  ;;  %p672_p1 = scmp.lt.s32.totalorder %s27_s10, %s27_s10 }
   0x3   :  { %p668_p0 = scmp.ne.s32.totalorder %s27_s10, %s667_s11  ;;  %p673_p2 = scmp.lt.s32.totalorder %s667_s11, %s667_s11 }
   0x5   :  { %p674_p3 = por %p673_p2, %p672_p1 }
   0x7   :  { %p675_p4 = pnand %p674_p3, %p668_p0 }
   0x9   :  { %678 = shalt.err (!%p675_p4)
}
   0xa   :  { %s682_s12 = smov 64   ;;  %s683_s13 = smov 4  }
   0xb   :  { %32 = dma.hbm_to_vmem [thread:$0]  %s823_s3, 2048, %s27_s10, [#allocation3], %s682_s12, %s682_s12, %s683_s13  }
   0xc   :  { %679 = dma.done.wait [#allocation3], 2048  }
   0xd   :  { %680 = vsyncadd [#allocation3], 4294965248  ;;  %v684_v0 = vmov 0   ;;  %v625_v1 = vld [vmem:[%s821_s1 + $0x14] ss:$8 sps:$4 sm:$0xff]   ;;  %v47_v5 = vld [vmem:[%s820_s0] sm:$0xff]  ;;  %v55_v29 = vlaneseq }
   0xe   :  { %121 = vmatprep.mubr.bf16.mxu0 %v684_v0  ;;  %v627_v2 = vld [vmem:[%s821_s1 + $0x10] ss:$8 sps:$4 sm:$0xff]   ;;  %101 = vmatprep.subr.bf16.mxu0 %v625_v1  ;;  %v628_v3 = vld [vmem:[%s821_s1 + $0x4] ss:$8 sps:$4 sm:$0xff]   ;;  %v630_v4 = vld [vmem:[%s821_s1] ss:$8 sps:$4 sm:$0xff]   ;;  %v48_v9 = vpack.c.bf16 %v47_v5, %v47_v5 }
   0xf   :  { %102 = vmatpush1.bf16.msra.mxu0 %v627_v2  ;;  %v631_v6 = vld [vmem:[#allocation2 + $0x78] sm:$0xff]   ;;  %v633_v8 = vld [vmem:[#allocation2 + $0x70] sm:$0xff]   ;;  %vm85_vm0 = vcmask 261120   ;;  %v635_v11 = vld [vmem:[#allocation2 + $0x68] sm:$0xff]   ;;  %v685_v24 = vmov 0.0   ;;  %v56_v30 = vshrl.u32 %v55_v29, 7 }
  0x10   :  { %103 = vmatprep.subr.bf16.mxu0 %v628_v3  ;;  %v632_v7 = vld [vmem:[#allocation2 + $0x38] sm:$0xff]   ;;  %551 = vmatprep.subr.bf16.mxu1 %v631_v6  ;;  %v634_v10 = vld [vmem:[#allocation2 + $0x30] sm:$0xff]   ;;  %v636_v12 = vld [vmem:[#allocation2 + $0x28] sm:$0xff]   ;;  %vm686_vm1 = vmmov 0   ;;  %vm463_vm2 = vcmask 523264   ;;  %vm507_vm3 = vcmask 15360  }
  0x11   :  { %552 = vmatpush3.bf16.msra.mxu1 %v632_v7  ;;  %v637_v13 = vld [vmem:[#allocation2 + $0x60] sm:$0xff]   ;;  %v639_v15 = vld [vmem:[#allocation2 + $0x58] sm:$0xff]   ;;  %v641_v17 = vld [vmem:[#allocation2 + $0x50] sm:$0xff]   ;;  %v57_v31 = vsub.s32 0, %v56_v30  ;;  %v61_v33 = vsub.s32 1, %v56_v30 }
  0x12   :  { %553 = vmatprep.subr.bf16.mxu1 %v633_v8  ;;  %v638_v14 = vld [vmem:[#allocation2 + $0x20] sm:$0xff]   ;;  %v640_v16 = vld [vmem:[#allocation2 + $0x18] sm:$0xff]   ;;  %v642_v18 = vld [vmem:[#allocation2 + $0x10] sm:$0xff]  }
  0x13   :  { %104 = vmatpush1.bf16.msra.mxu0 %v630_v4  ;;  %v643_v19 = vld [vmem:[#allocation2 + $0x48] sm:$0xff]   ;;  %v645_v21 = vld [vmem:[#allocation2 + $0x40] sm:$0xff]   ;;  %v647_v23 = vld [vmem:[%s825_s5 + $0x38] sm:$0xff]  }
  0x14   :  { %v644_v20 = vld [vmem:[#allocation2 + $0x8] sm:$0xff]   ;;  %v646_v22 = vld [vmem:[#allocation2] sm:$0xff]   ;;  %587 = vmatprep.subr.bf16.mxu0 %v685_v24  ;;  %v648_v25 = vld [vmem:[%s825_s5 + $0x30] sm:$0xff]  }
  0x15   :  { %554 = vmatpush3.bf16.msra.mxu1 %v634_v10  ;;  %v649_v26 = vld [vmem:[%s825_s5 + $0x28] sm:$0xff]   ;;  %v650_v27 = vld [vmem:[%s825_s5 + $0x20] sm:$0xff]   ;;  %v651_v28 = vld [vmem:[%s825_s5 + $0x18] sm:$0xff]  }
  0x16   :  { %518 = vmatmul.mubr.msk.bf16.vlgmr.msra.gmra.mxu0 %vm85_vm0, %v48_v9  ;;  %555 = vmatprep.subr.bf16.mxu1 %v635_v11  ;;  %v53_v32 = vld [vmem:[%s822_s2] sm:$0x3]  ;;  %v652_v46 = vld [vmem:[%s825_s5 + $0x10] sm:$0xff]   ;;  %v653_v47 = vld [vmem:[%s825_s5 + $0x8] sm:$0xff]  }
  0x17   :  { %588 = vmatpush3.bf16.msra.mxu0 %v647_v23  ;;  %v58_v34 = vrot.slane %v53_v32, %v57_v31  ;;  %v62_v35 = vrot.slane %v53_v32, %v61_v33  ;;  %v654_v48 = vld [vmem:[%s825_s5] sm:$0xff]   ;;  %603 = vmatprep.mubr.msk.bf16.mxu0 %vm686_vm1, %v685_v24  ;;  %v655_v49 = vld [vmem:[%s827_s7 + $0x18] sm:$0xff]   ;;  %v656_v50 = vld [vmem:[%s827_s7 + $0x10] sm:$0xff]  }
  0x18   :  { %589 = vmatprep.subr.bf16.mxu0 %v685_v24  ;;  %v519_v52 = vld [vmem:[%s824_s4] ss:$0 sm:$0xff]  ;;  %v657_v60 = vld [vmem:[%s827_s7 + $0x8] sm:$0xff]  }
  0x19   :  { %556 = vmatpush3.bf16.msra.mxu1 %v636_v12  ;;  %v658_v61 = vld [vmem:[%s827_s7] sm:$0xff]  }
  0x1a   :  { %557 = vmatprep.subr.bf16.mxu1 %v637_v13  ;;  %v536_v62 = vld [vmem:[%s826_s6] ss:$0 sm:$0xff] }
  0x1b   :  { %590 = vmatpush3.bf16.msra.mxu0 %v648_v25  ;;  %v545_v6 = vld [vmem:[%s828_s8] ss:$0 sm:$0xff] }
  0x1c   :  { %591 = vmatprep.subr.bf16.mxu0 %v685_v24 }
  0x1d   :  { %558 = vmatpush3.bf16.msra.mxu1 %v638_v14 }
  0x1e   :  { %559 = vmatprep.subr.bf16.mxu1 %v639_v15 }
  0x1f   :  { %592 = vmatpush3.bf16.msra.mxu0 %v649_v26 }
  0x20   :  { %593 = vmatprep.subr.bf16.mxu0 %v685_v24 }
  0x21   :  { %560 = vmatpush3.bf16.msra.mxu1 %v640_v16 }
  0x22   :  { %561 = vmatprep.subr.bf16.mxu1 %v641_v17 }
  0x23   :  { %594 = vmatpush3.bf16.msra.mxu0 %v650_v27 }
  0x24   :  { %595 = vmatprep.subr.bf16.mxu0 %v685_v24 }
  0x25   :  { %562 = vmatpush3.bf16.msra.mxu1 %v642_v18 }
  0x26   :  { %563 = vmatprep.subr.bf16.mxu1 %v643_v19 }
  0x27   :  { %596 = vmatpush3.bf16.msra.mxu0 %v651_v28 }
  0x28   :  { %597 = vmatprep.subr.bf16.mxu0 %v685_v24 }
  0x29   :  { %564 = vmatpush3.bf16.msra.mxu1 %v644_v20 }
  0x2a   :  { %565 = vmatprep.subr.bf16.mxu1 %v645_v21 }
  0x2b   :  { %598 = vmatpush3.bf16.msra.mxu0 %v652_v46 }
  0x2c   :  { %599 = vmatprep.subr.bf16.mxu0 %v685_v24 }
  0x2d   :  { %566 = vmatpush3.bf16.msra.mxu1 %v646_v22 }
  0x2e   :  { %607 = vmatprep.subr.bf16.mxu1 %v685_v24 }
  0x2f   :  { %600 = vmatpush3.bf16.msra.mxu0 %v653_v47 }
  0x30   :  { %601 = vmatprep.subr.bf16.mxu0 %v685_v24 }
  0x33   :  { %602 = vmatpush3.bf16.msra.mxu0 %v654_v48 }
  0xd6   :  { %v123_v36 = vpop.f32.mrf.mxu0 }
  0xd7   :  { %v124_v37 = vadd.f32 %v123_v36, %v58_v34 }
  0xd8   :  { %v125_v38 = vpop.f32.mrf.mxu0 }
  0xd9   :  { %v126_v39 = vadd.f32 %v125_v38, %v62_v35  ;;  %v130_v40 = vmax.f32 %v124_v37, 0.0 }
  0xda   :  { %v127_v41 = vpop.f32.mrf.mxu0 }
  0xdb   :  { %v131_v42 = vmax.f32 %v126_v39, 0.0  ;;  %v132_v45 = vpack.c.bf16 %v130_v40, %v130_v40 }
  0xdc   :  { %v128_v43 = vpop.f32.mrf.mxu0 }
  0xdd   :  { %v133_v44 = vpack.c.bf16 %v131_v42, %v131_v42 }
  0xdf   :  { %301 = vmatprep.mubr.bf16.mxu1 %v133_v44 }
  0xe0   :  { %302 = vmatmul.mubr.bf16.vlgmr.msra.gmra.mxu1 %v132_v45 }
  0xe1   :  { %615 = vmatprep.mubr.msk.bf16.mxu1 %vm686_vm1, %v685_v24  ;;  %608 = vmatpush3.bf16.msra.mxu1 %v655_v49 }
  0xe2   :  { %609 = vmatprep.subr.bf16.mxu1 %v685_v24 }
  0xe5   :  { %610 = vmatpush3.bf16.msra.mxu1 %v656_v50 }
  0xe6   :  { %611 = vmatprep.subr.bf16.mxu1 %v685_v24 }
  0xe9   :  { %612 = vmatpush3.bf16.msra.mxu1 %v657_v60 }
  0xea   :  { %613 = vmatprep.subr.bf16.mxu1 %v685_v24 }
  0xed   :  { %614 = vmatpush3.bf16.msra.mxu1 %v658_v61 }
 0x1a0   :  { %v567_v51 = vpop.f32.mrf.mxu1 }
 0x1a2   :  { %v568_v53 = vpop.f32.mrf.mxu1 }
 0x1a3   :  { %v569_v54 = vadd.f32 %v568_v53, %v567_v51 }
 0x1a4   :  { %v570_v55 = vpop.f32.mrf.mxu1 }
 0x1a5   :  { %v304_v56 = vadd.f32 %v569_v54, %v519_v52 }
 0x1a6   :  { %v571_v57 = vpop.f32.mrf.mxu1 }
 0x1a7   :  { %v309_v58 = vmax.f32 %v304_v56, 0.0 }
 0x1a9   :  { %v310_v59 = vpack.c.bf16 %v309_v58, %v309_v58 }
 0x1ab   :  { %604 = vmatmul.mubr.bf16.vlgmr.msra.gmra.mxu0 %v310_v59 }
 0x26b   :  { %v416_v63 = vpop.f32.mrf.mxu0 }
 0x26c   :  { %v417_v0 = vadd.f32 %v536_v62, %v416_v63 }
 0x26d   :  { %v605_v1 = vpop.f32.mrf.mxu0 }
 0x26e   :  { %v422_v2 = vmax.f32 %v417_v0, 0.0 }
 0x26f   :  { %v419_v3 = vpop.f32.mrf.mxu0 }
 0x270   :  { %v423_v4 = vpack.c.bf16 %v422_v2, %v422_v2 }
 0x271   :  { %v606_v5 = vpop.f32.mrf.mxu0 }
 0x272   :  { %616 = vmatmul.mubr.msk.bf16.vlgmr.msra.gmra.mxu1 %vm463_vm2, %v423_v4 }
 0x332   :  { %v501_v7 = vpop.f32.mrf.mxu1 }
 0x333   :  { %v502_v8 = vadd.f32 %v545_v6, %v501_v7 }
 0x334   :  { %v617_v9 = vpop.f32.mrf.mxu1 }
 0x335   :  { %508 = vst.msk [vmem:[%s829_s9] sm:$0xff] %vm507_vm3, %v502_v8 }
 0x336   :  { %v504_v10 = vpop.f32.mrf.mxu1 }
 0x338   :  { %v618_v11 = vpop.f32.mrf.mxu1 }
 0x339   :  { %513 = vsyncpa [#allocation3], 1 }

</bundles_post_ra>
